<compile_context>
chip_gen: v7x
topology: tpu7x:2x2x1
jax: 0.10.0
libtpu: 0.0.40
codegen_flags: <defaults>
</compile_context>

<pallas_src>
import functools

import jax
import jax.numpy as jnp
from jax.experimental import pallas as pl
from jax.experimental.pallas import tpu as pltpu


def _ce_kernel(x_ref, t_ref, loss_ref, cnt_ref, *, ignore_index):
    # Grid: (n, j) = (batch index, pixel-tile index).  Outputs are per-n
    # accumulators resident in VMEM across the j ("arbitrary") axis.
    j = pl.program_id(1)

    @pl.when(j == 0)
    def _():
        loss_ref[...] = jnp.zeros_like(loss_ref)
        cnt_ref[...] = jnp.zeros_like(cnt_ref)

    x = x_ref[0].astype(jnp.float32)      # (C, TP)  logits, classes on sublanes
    t = t_ref[0]                          # (1, TP)  int32 labels, lane-dense

    # Numerically stable log-sum-exp over the class (sublane) axis.
    m = jnp.max(x, axis=0, keepdims=True)                                # (1, TP)
    lse = jnp.log(jnp.sum(jnp.exp(x - m), axis=0, keepdims=True)) + m    # (1, TP)

    # Gather logit at the target class via one-hot compare (no dynamic gather).
    cls = jax.lax.broadcasted_iota(jnp.int32, x.shape, 0)                # (C, TP)
    onehot = (cls == t).astype(jnp.float32)                              # (C, TP)
    picked = jnp.sum(x * onehot, axis=0, keepdims=True)                  # (1, TP)

    valid = (t != ignore_index).astype(jnp.float32)                      # (1, TP)

    # Lane-wise partial accumulation (no cross-lane reduction in-kernel).
    loss_ref[0] += (lse - picked) * valid                                # (1, TP)
    cnt_ref[0] += valid                                                  # (1, TP)


def cross_entropy_loss(preds, target, *, ignore_index=255, tile=None,
                       vmem_input_budget_bytes=16 * 1024 * 1024):
    """Mean cross-entropy over non-ignored pixels (PyTorch semantics).

    preds:  (N, C, H, W) logits (any float dtype; math is f32 in-kernel)
    target: (N, H, W) integer labels, `ignore_index` pixels are excluded.
    Note: if every pixel is ignore_index the result is NaN (matches PyTorch).
    """
    N, C, H, W = preds.shape
    HW = H * W

    # Free views, no transpose / extra HBM traffic.
    x = preds.reshape(N, C, HW)
    t = target.reshape(N, 1, HW).astype(jnp.int32)

    if tile is None:
        # Pixel-tile sized so that double-buffered inputs stay well inside the
        # scoped VMEM limit on every TPU generation (v7x: 64 MiB physical).
        bytes_per_pixel = C * x.dtype.itemsize + 4          # logits column + label
        max_tile = vmem_input_budget_bytes // (2 * bytes_per_pixel)
        tile = max(128, min(2048, (max_tile // 128) * 128))
    # Don't over-pad tiny inputs.
    tile = max(128, min(tile, pl.cdiv(HW, 128) * 128))

    pad = (-HW) % tile
    if pad:
        x = jnp.pad(x, ((0, 0), (0, 0), (0, pad)))
        t = jnp.pad(t, ((0, 0), (0, 0), (0, pad)), constant_values=ignore_index)
    HWp = HW + pad
    n_tiles = HWp // tile

    loss_part, cnt_part = pl.pallas_call(
        functools.partial(_ce_kernel, ignore_index=ignore_index),
        out_shape=(
            jax.ShapeDtypeStruct((N, 1, tile), jnp.float32),   # per-batch lane-wise loss sums
            jax.ShapeDtypeStruct((N, 1, tile), jnp.float32),   # per-batch lane-wise valid counts
        ),
        grid=(N, n_tiles),
        in_specs=[
            pl.BlockSpec((1, C, tile), lambda n, j: (n, 0, j)),
            pl.BlockSpec((1, 1, tile), lambda n, j: (n, 0, j)),
        ],
        out_specs=(
            pl.BlockSpec((1, 1, tile), lambda n, j: (n, 0, 0)),
            pl.BlockSpec((1, 1, tile), lambda n, j: (n, 0, 0)),
        ),
        compiler_params=pltpu.CompilerParams(
            dimension_semantics=("parallel", "arbitrary"),
            vmem_limit_bytes=64 * 1024 * 1024,
        ),
    )(x, t)

    # Final (tiny) reduction + mean over valid pixels in plain XLA.
    return jnp.sum(loss_part) / jnp.sum(cnt_part)


def _reference_loss(preds, target, ignore_index=255):
    """Pure-JAX reference matching torch.nn.CrossEntropyLoss(mean, ignore_index)."""
    N, C, H, W = preds.shape
    x = jnp.transpose(preds, (0, 2, 3, 1)).reshape(-1, C).astype(jnp.float32)
    t = target.reshape(-1).astype(jnp.int32)
    logp = jax.nn.log_softmax(x, axis=-1)
    safe_t = jnp.where(t == ignore_index, 0, t)
    nll = -jnp.take_along_axis(logp, safe_t[:, None], axis=-1)[:, 0]
    valid = (t != ignore_index).astype(jnp.float32)
    return jnp.sum(nll * valid) / jnp.sum(valid)


if __name__ == "__main__":
    key = jax.random.PRNGKey(0)
    k1, k2, k3 = jax.random.split(key, 3)

    N, C, H, W = 2, 4, 16, 16
    preds = jax.random.normal(k1, (N, C, H, W), dtype=jnp.float32)
    target = jax.random.randint(k2, (N, H, W), 0, C, dtype=jnp.int32)
    # Sprinkle some ignore_index (255) pixels deterministically.
    ignore_mask = jax.random.bernoulli(k3, 0.1, (N, H, W))
    target = jnp.where(ignore_mask, 255, target)

    loss = cross_entropy_loss(preds, target, ignore_index=255)
    loss = jax.block_until_ready(loss)

    ref = jax.block_until_ready(_reference_loss(preds, target, ignore_index=255))
    assert jnp.allclose(loss, ref, rtol=1e-5, atol=1e-5), (loss, ref)

    print("KERNEL_OK")
</pallas_src>

<mosaic_0001>
module attributes {stable_mosaic.version = 11 : i64} {
  func.func @_ce_kernel(%arg0: i32, %arg1: i32, %arg2: memref<1x4x256xf32, #tpu.memory_space<vmem>>, %arg3: memref<1x1x256xi32, #tpu.memory_space<vmem>>, %arg4: memref<1x1x256xf32, #tpu.memory_space<vmem>>, %arg5: memref<1x1x256xf32, #tpu.memory_space<vmem>>) attributes {dimension_semantics = [#tpu.dimension_semantics<parallel>, #tpu.dimension_semantics<arbitrary>], iteration_bounds = array<i64: 2, 1>, scalar_prefetch = 0 : i64, scratch_operands = 0 : i64, tpu.core_type = #tpu.core_type<tc>, window_params = [{transform_indices = @transform_0, window_bounds = array<i64: 1, 4, 256>}, {transform_indices = @transform_1, window_bounds = array<i64: 1, 1, 256>}, {transform_indices = @transform_2, window_bounds = array<i64: 1, 1, 256>}, {transform_indices = @transform_3, window_bounds = array<i64: 1, 1, 256>}]} {
    %c0_i32 = arith.constant 0 : i32
    %0 = arith.cmpi eq, %arg1, %c0_i32 : i32
    %1 = arith.extui %0 : i1 to i32
    %c0_i32_0 = arith.constant 0 : i32
    %2 = arith.cmpi ne, %1, %c0_i32_0 : i32
    scf.if %2 {
      %cst_20 = arith.constant 0.000000e+00 : f32
      %42 = vector.broadcast %cst_20 : f32 to vector<1x1x256xf32>
      %c0_21 = arith.constant 0 : index
      %c0_22 = arith.constant 0 : index
      %c0_23 = arith.constant 0 : index
      %43 = vector.load %arg4[%c0_21, %c0_22, %c0_23] : memref<1x1x256xf32, #tpu.memory_space<vmem>>, vector<1x1x256xf32>
      tpu.vector_store %arg4[%c0_21, %c0_22, %c0_23], %42 {strides = array<i32>} : memref<1x1x256xf32, #tpu.memory_space<vmem>>, vector<1x1x256xf32>,
      %cst_24 = arith.constant 0.000000e+00 : f32
      %44 = vector.broadcast %cst_24 : f32 to vector<1x1x256xf32>
      %c0_25 = arith.constant 0 : index
      %c0_26 = arith.constant 0 : index
      %c0_27 = arith.constant 0 : index
      %45 = vector.load %arg5[%c0_25, %c0_26, %c0_27] : memref<1x1x256xf32, #tpu.memory_space<vmem>>, vector<1x1x256xf32>
      tpu.vector_store %arg5[%c0_25, %c0_26, %c0_27], %44 {strides = array<i32>} : memref<1x1x256xf32, #tpu.memory_space<vmem>>, vector<1x1x256xf32>,
    } else {
    }
    %c0 = arith.constant 0 : index
    %c0_1 = arith.constant 0 : index
    %c0_2 = arith.constant 0 : index
    %3 = vector.load %arg2[%c0, %c0_1, %c0_2] : memref<1x4x256xf32, #tpu.memory_space<vmem>>, vector<1x4x256xf32>
    %4 = vector.shape_cast %3 : vector<1x4x256xf32> to vector<4x256xf32>
    %c0_3 = arith.constant 0 : index
    %c0_4 = arith.constant 0 : index
    %c0_5 = arith.constant 0 : index
    %5 = vector.load %arg3[%c0_3, %c0_4, %c0_5] : memref<1x1x256xi32, #tpu.memory_space<vmem>>, vector<1x1x256xi32>
    %6 = vector.shape_cast %5 : vector<1x1x256xi32> to vector<1x256xi32>
    %cst = arith.constant dense<0xFF800000> : vector<256xf32>
    %7 = vector.multi_reduction <maximumf>, %4, %cst [0] : vector<4x256xf32> to vector<256xf32>
    %8 = vector.shape_cast %7 : vector<256xf32> to vector<1x256xf32>
    %9 = vector.broadcast %8 : vector<1x256xf32> to vector<4x256xf32>
    %10 = arith.subf %4, %9 : vector<4x256xf32>
    %11 = math.exp %10 : vector<4x256xf32>
    %cst_6 = arith.constant dense<0.000000e+00> : vector<256xf32>
    %12 = vector.multi_reduction <add>, %11, %cst_6 [0] : vector<4x256xf32> to vector<256xf32>
    %13 = vector.shape_cast %12 : vector<256xf32> to vector<1x256xf32>
    %14 = math.log %13 : vector<1x256xf32>
    %15 = arith.addf %14, %8 : vector<1x256xf32>
    %16 = tpu.iota {dimensions = array<i32: 0>} : vector<4x256xi32>
    %17 = vector.broadcast %6 : vector<1x256xi32> to vector<4x256xi32>
    %18 = arith.cmpi eq, %16, %17 : vector<4x256xi32>
    %19 = arith.extui %18 : vector<4x256xi1> to vector<4x256xi32>
    %20 = arith.sitofp %19 : vector<4x256xi32> to vector<4x256xf32>
    %21 = arith.mulf %4, %20 : vector<4x256xf32>
    %cst_7 = arith.constant dense<0.000000e+00> : vector<256xf32>
    %22 = vector.multi_reduction <add>, %21, %cst_7 [0] : vector<4x256xf32> to vector<256xf32>
    %23 = vector.shape_cast %22 : vector<256xf32> to vector<1x256xf32>
    %c255_i32 = arith.constant 255 : i32
    %24 = vector.broadcast %c255_i32 : i32 to vector<1x256xi32>
    %25 = arith.cmpi ne, %6, %24 : vector<1x256xi32>
    %26 = arith.extui %25 : vector<1x256xi1> to vector<1x256xi32>
    %27 = arith.sitofp %26 : vector<1x256xi32> to vector<1x256xf32>
    %c0_8 = arith.constant 0 : index
    %c0_9 = arith.constant 0 : index
    %c0_10 = arith.constant 0 : index
    %28 = vector.load %arg4[%c0_8, %c0_9, %c0_10] : memref<1x1x256xf32, #tpu.memory_space<vmem>>, vector<1x1x256xf32>
    %29 = vector.shape_cast %28 : vector<1x1x256xf32> to vector<1x256xf32>
    %30 = arith.subf %15, %23 : vector<1x256xf32>
    %31 = arith.mulf %30, %27 : vector<1x256xf32>
    %32 = arith.addf %29, %31 : vector<1x256xf32>
    %c0_11 = arith.constant 0 : index
    %c0_12 = arith.constant 0 : index
    %c0_13 = arith.constant 0 : index
    %33 = vector.load %arg4[%c0_11, %c0_12, %c0_13] : memref<1x1x256xf32, #tpu.memory_space<vmem>>, vector<1x1x256xf32>
    %34 = vector.shape_cast %33 : vector<1x1x256xf32> to vector<1x256xf32>
    %35 = vector.shape_cast %32 : vector<1x256xf32> to vector<1x1x256xf32>
    tpu.vector_store %arg4[%c0_11, %c0_12, %c0_13], %35 {strides = array<i32>} : memref<1x1x256xf32, #tpu.memory_space<vmem>>, vector<1x1x256xf32>,
    %c0_14 = arith.constant 0 : index
    %c0_15 = arith.constant 0 : index
    %c0_16 = arith.constant 0 : index
    %36 = vector.load %arg5[%c0_14, %c0_15, %c0_16] : memref<1x1x256xf32, #tpu.memory_space<vmem>>, vector<1x1x256xf32>
    %37 = vector.shape_cast %36 : vector<1x1x256xf32> to vector<1x256xf32>
    %38 = arith.addf %37, %27 : vector<1x256xf32>
    %c0_17 = arith.constant 0 : index
    %c0_18 = arith.constant 0 : index
    %c0_19 = arith.constant 0 : index
    %39 = vector.load %arg5[%c0_17, %c0_18, %c0_19] : memref<1x1x256xf32, #tpu.memory_space<vmem>>, vector<1x1x256xf32>
    %40 = vector.shape_cast %39 : vector<1x1x256xf32> to vector<1x256xf32>
    %41 = vector.shape_cast %38 : vector<1x256xf32> to vector<1x1x256xf32>
    tpu.vector_store %arg5[%c0_17, %c0_18, %c0_19], %41 {strides = array<i32>} : memref<1x1x256xf32, #tpu.memory_space<vmem>>, vector<1x1x256xf32>,
    return
  }
  func.func @transform_0(%arg0: i32, %arg1: i32) -> (i32, i32, i32) {
    %c0_i32 = arith.constant 0 : i32
    %c0_i32_0 = arith.constant 0 : i32
    return %arg0, %c0_i32, %arg1 : i32, i32, i32
  }
  func.func @transform_1(%arg0: i32, %arg1: i32) -> (i32, i32, i32) {
    %c0_i32 = arith.constant 0 : i32
    %c0_i32_0 = arith.constant 0 : i32
    return %arg0, %c0_i32, %arg1 : i32, i32, i32
  }
  func.func @transform_2(%arg0: i32, %arg1: i32) -> (i32, i32, i32) {
    %c0_i32 = arith.constant 0 : i32
    %c0_i32_0 = arith.constant 0 : i32
    %c0_i32_1 = arith.constant 0 : i32
    return %arg0, %c0_i32, %c0_i32_0 : i32, i32, i32
  }
  func.func @transform_3(%arg0: i32, %arg1: i32) -> (i32, i32, i32) {
    %c0_i32 = arith.constant 0 : i32
    %c0_i32_0 = arith.constant 0 : i32
    %c0_i32_1 = arith.constant 0 : i32
    return %arg0, %c0_i32, %c0_i32_0 : i32, i32, i32
  }
}

</mosaic_0001>

<bundles_post_ra>
// kernel: tpu_custom_call.1
= control target key start
LH: loop header
LB: loop body
LE: loop exit
PB: predicated region body
PF: predicated region fallthrough
CT: control target
= control target key end

     0   :  { %9 = vsyncpa [#allocation3], 0  ;;  %s1188_s0 = inlined_call_operand.hbm [shape: f32[2,4,256], index: 0, kind: input, shape index: {}]   ;;  %s1189_s1 = inlined_call_operand.hbm [shape: s32[2,1,256], index: 1, kind: input, shape index: {}]   ;;  %s1190_s2 = inlined_call_operand.hbm [shape: f32[2,1,256], index: 2, kind: output, shape index: {0}]   ;;  %s1191_s3 = inlined_call_operand.hbm [shape: f32[2,1,256], index: 3, kind: output, shape index: {1}]  }
   0x1   :  { %11 = vsyncpa [#allocation3 + $0x1], 0 }
   0x2   :  { %12 = vsyncpa [#allocation6], 0 }
   0x3   :  { %14 = vsyncpa [#allocation6 + $0x1], 0 }
   0x4   :  { %15 = vsyncpa [#allocation4], 0 }
   0x5   :  { %17 = vsyncpa [#allocation4 + $0x1], 0 }
   0x6   :  { %18 = vsyncpa [#allocation9], 0 }
   0x7   :  { %20 = vsyncpa [#allocation9 + $0x1], 0  ;;  %s892_s12 = smov 0   ;;  %s894_s13 = smov 0  }
   0x8   :  { %s896_s14 = smov 0   ;;  %s898_s15 = smov 0  }
   0x9   :  { %s900_s16 = smov 0   ;;  %s902_s17 = smov 0  }
   0xa LB: > { %s575_s18 = sadd.s32 4294967295, %s864_s17   ;;  %s576_s19 = sadd.s32 4294967294, %s864_s17   ;;  %s864_s17 = sphi %s902_s17, %s26_s17   ;;  %s860_s16 = sphi %s900_s16, %s1213_s16   ;;  %s856_s15 = sphi %s898_s15, %s1212_s15   ;;  %s852_s14 = sphi %s896_s14, %s1211_s14   ;;  %s848_s13 = sphi %s894_s13, %s1210_s13   ;;  %s844_s12 = sphi %s892_s12, %s1209_s12  }
   0xb   : > { %s38_s20 = sadd.s32 1, %s860_s16  ;;  %s47_s21 = sadd.s32 1, %s852_s14 }
   0xc   : > { %p40_p0 = scmp.ge.s32.totalorder %s38_s20, 2  ;;  %p54_p1 = scmp.ne.s32.totalorder %s852_s14, %s848_s13 }
   0xd   : > { %p55_p2 = scmp.eq.s32.totalorder %s864_s17, 0  ;;  %p60_p3 = scmp.ne.s32.totalorder %s848_s13, %s844_s12 }
   0xe   : > { %s1215_s20 = smov (%p40_p0, %s38_s20), 0  ;;  %p61_p5 = scmp.eq.s32.totalorder %s575_s18, 0 }
   0xf   : > { %p933_p4 = por %p55_p2, %p54_p1  ;;  %s42_s23 = ssub.s32 %s860_s16, %s1215_s20 }
  0x10   : > { %p112_p6 = scmp.eq.s32.totalorder %s575_s18, 1  ;;  %p45_p7 = scmp.eq.s32.totalorder %s42_s23, 0 }
  0x11   : > { %p939_p8 = por %p61_p5, %p60_p3  ;;  %p118_p10 = scmp.eq.s32.totalorder %s576_s19, 1 }
  0x12   : > { %p943_p9 = por %p112_p6, %p54_p1  ;;  %p627_p13 = scmp.lt.s32.totalorder %s864_s17, 2 }
  0x13   : > { %s1195_s24 = scalar_select %p939_p8, 1, 0 }
  0x14   : > { %s1196_s25 = scalar_select %p943_p9, 1, 0 }
  0x15   : > { %s948_s26 = scalar_select %p45_p7, %s852_s14, %s47_s21  }
  0x16   : > { %p950_p11 = por %p118_p10, %p60_p3  ;;  %s957_s28 = sand.u32 1, %s852_s14  }
  0x17   : > { %s579_s29 = sshll.u32 %s957_s28, 3  ;;  %s601_s30 = sshll.u32 %s860_s16, 7 }
  0x18   : > { %s1197_s27 = scalar_select %p950_p11, 1, 0 }
  0x19   : > { %s964_s6 = scalar_lea.hbm %s1188_s0, %s601_s30  ;;  %s168_s7 = scalar_lea.vmem [#allocation2], %s579_s29 }
  0x1a   : > { %s178_s8 = sshll.u32 %s168_s7, 4  ;;  %p970_p0 = pnand %p627_p13, %p933_p4  ;;  %s966_s8 = int_to_ptr.vmem [resolvable:$true] %s178_s8 }
  0x1b   : > { %s165_s10 = scalar_lea.sflag [#allocation3], %s957_s28  ;;  %s686_s11 = scalar_lea.hbm %s964_s6, 128 }
  0x1c   : > { %p687_p3 = scmp.ne.s32.totalorder %s964_s6, %s686_s11  ;;  %p688_p5 = pneg %p970_p0 }
  0x1d   : > { %s691_s21 = scalar_lea.hbm %s1188_s0, 256  ;;  %p692_p4 = scmp.lt.u32.totalorder %s964_s6, %s1188_s0 }
  0x1e   : > { %p689_p6 = pnand %p688_p5, %p687_p3  ;;  %p693_p10 = scmp.lt.u32.totalorder %s691_s21, %s686_s11 }
  0x1f   : > { %p695_p12 = scmp.lt.u32.totalorder %s686_s11, %s964_s6 }
  0x20   : > { %p690_p7 = pneg %p689_p6  ;;  %p694_p13 = por %p693_p10, %p692_p4 }
  0x22   : > { %p696_p1 = por %p695_p12, %p694_p13 }
  0x24   : > { %p697_p2 = pnand %p696_p1, %p690_p7 }
  0x26   : > { %700 = shalt.err (!%p697_p2)
}
  0x27   : > { %s701_s29 = scalar_lea.vmem %s966_s8, 128  ;;  %s866_s30 = smov [#allocation2]  }
  0x28   : > { %p702_p3 = scmp.ne.s32.totalorder %s966_s8, %s701_s29  ;;  %s706_s4 = sshll.u32 %s866_s30, 4  ;;  %s707_s4 = int_to_ptr.vmem [resolvable:$false] %s706_s4 }
  0x29   : > { %s708_s5 = scalar_lea.vmem %s707_s4, 256  ;;  %p709_p9 = scmp.lt.s32.totalorder %s966_s8, %s707_s4 }
  0x2a   : > { %p704_p6 = pnand %p702_p3, %p688_p5  ;;  %p710_p4 = scmp.lt.s32.totalorder %s708_s5, %s701_s29 }
  0x2c   : > { %p705_p11 = pneg %p704_p6  ;;  %p711_p10 = por %p710_p4, %p709_p9 }
  0x2e   : > { %p712_p12 = pnand %p711_p10, %p705_p11 }
  0x30   : > { %715 = shalt.err (!%p712_p12)
}
  0x31   : > { %616 = dma.hbm_to_vmem [thread:$0]  (!%p970_p0), %s964_s6, 128, %s966_s8, %s165_s10  }
  0x32   : > { %p1199_p1 = scmp.lt.s32.totalorder %s864_s17, 3  ;;  %p1200_p2 = scmp.ge.s32.totalorder %s864_s17, 1 }
  0x33   : > { %s582_s11 = sshll.u32 %s957_s28, 1  ;;  %s602_s18 = sshll.u32 %s860_s16, 5 }
  0x34   : > { %p1006_p7 = pnand %p1200_p2, %p1199_p1  ;;  %s1015_s22 = scalar_lea.hbm %s1189_s1, %s602_s18 }
  0x35   : > { %s189_s23 = scalar_lea.vmem [#allocation5], %s582_s11  ;;  %s186_s6 = scalar_lea.sflag [#allocation6], %s957_s28 }
  0x36   : > { %s1201_s7 = scalar_select %p1006_p7, 1, 0 }
  0x37   : > { %s199_s29 = sshll.u32 %s189_s23, 4  ;;  %s716_s8 = scalar_lea.hbm %s1015_s22, 32  ;;  %s200_s29 = int_to_ptr.vmem [resolvable:$true] %s199_s29 }
  0x38   : > { %p717_p9 = scmp.ne.s32.totalorder %s1015_s22, %s716_s8  ;;  %s721_s4 = scalar_lea.hbm %s1189_s1, 64 }
  0x39   : > { %p722_p3 = scmp.lt.u32.totalorder %s1015_s22, %s1189_s1  ;;  %p723_p6 = scmp.lt.u32.totalorder %s721_s4, %s716_s8 }
  0x3a   : > { %p719_p11 = pnand %p717_p9, %p688_p5  ;;  %p725_p10 = scmp.lt.u32.totalorder %s716_s8, %s1015_s22 }
  0x3b   : > { %p724_p4 = por %p723_p6, %p722_p3 }
  0x3c   : > { %p720_p13 = pneg %p719_p11 }
  0x3d   : > { %p726_p12 = por %p725_p10, %p724_p4 }
  0x3f   : > { %p727_p1 = pnand %p726_p12, %p720_p13 }
  0x41   : > { %730 = shalt.err (!%p727_p1)
}
  0x42   : > { %s731_s28 = scalar_lea.vmem %s200_s29, 32  ;;  %s867_s11 = smov [#allocation5]  }
  0x43   : > { %p732_p2 = scmp.ne.s32.totalorder %s200_s29, %s731_s28  ;;  %s736_s19 = sshll.u32 %s867_s11, 4  ;;  %s737_s19 = int_to_ptr.vmem [resolvable:$false] %s736_s19 }
  0x44   : > { %s738_s21 = scalar_lea.vmem %s737_s19, 64  ;;  %p739_p8 = scmp.lt.s32.totalorder %s200_s29, %s737_s19 }
  0x45   : > { %p734_p9 = pnand %p732_p2, %p688_p5  ;;  %p740_p7 = scmp.lt.s32.totalorder %s738_s21, %s731_s28 }
  0x47   : > { %p735_p11 = pneg %p734_p9  ;;  %p741_p3 = por %p740_p7, %p739_p8 }
  0x49   : > { %p742_p6 = pnand %p741_p3, %p735_p11 }
  0x4b   : > { %745 = shalt.err (!%p742_p6)
}
  0x4c   : > { %619 = dma.hbm_to_vmem [thread:$0]  (!%p970_p0), %s1015_s22, 32, %s200_s29, %s186_s6  }
  0x4d   : > { %p1202_p13 = scmp.ne.s32.totalorder %s1201_s7, 0 }
  0x4e   : > { %s1040_s23 = sand.u32 (!%p1202_p13), 1, %s848_s13   ;;  %p1203_p5 = scmp.ne.s32.totalorder (!%p1202_p13), %s1195_s24, 0 }
  0x4f   : > { %208 = sbr.rel (%p1202_p13) target bundleno = 195 (0xc3), region = 28  ;;  %s586_s8 = sshll.u32 (!%p1202_p13), %s1040_s23, 3 }
  0x50   : > { %s211_s10 = scalar_lea.sflag (!%p1202_p13), [#allocation3], %s1040_s23  ;;  %s214_s30 = scalar_lea.vmem (!%p1202_p13), [#allocation2], %s586_s8 }
  0x56   : > { %827 = dma.done.wait (%p1203_p5), %s211_s10, 128  }
  0x57   : > { %829 = vsyncadd (%p1203_p5), %s211_s10, 4294967168  ;;  %s587_s9 = sshll.u32 %s1040_s23, 1  ;;  %s220_s7 = scalar_lea.sflag [#allocation6], %s1040_s23 }
  0x58   : > { %s223_s22 = scalar_lea.vmem [#allocation5], %s587_s9 }
  0x59   : > { %831 = dma.done.wait (%p1203_p5), %s220_s7, 32  }
  0x5a   : > { %833 = vsyncadd (%p1203_p5), %s220_s7, 4294967264  ;;  %v262_v0 = vlaneseq  ;;  %s1058_s29 = scalar_lea.vmem [#allocation7], %s587_s9  ;;  %v868_v2 = vmov 0.0   ;;  %s255_s6 = scalar_lea.vmem [#allocation8], %s587_s9  ;;  %vm273_vm1 = vcmask 1043456   ;;  %v1067_v3 = vld [vmem:[%s214_s30] sm:$0xff] }
  0x5b   : > { %v269_v4 = vld [vmem:[%s223_s22] sm:$0x3]  ;;  %v271_v5 = vcombine.high %v1067_v3, %v1067_v3  ;;  %v274_v6 = vsel %vm273_vm1, %v1067_v3, -inf  ;;  %s603_s24 = sshll.u32 %s856_s15, 5  ;;  %s436_s4 = sshll.u32 %s255_s6, 4  ;;  %s1086_s4 = int_to_ptr.vmem [resolvable:$true] %s436_s4 }
  0x5c   : > { %vm1054_vm0 = vcmp.lt.s32.totalorder %v262_v0, 256  ;;  %v275_v7 = vrot.slane %v274_v6, 4  ;;  %vm356_vm2 = vcmp.ne.s32.totalorder %v269_v4, 255  ;;  %s1084_s28 = scalar_lea.hbm %s1191_s3, %s603_s24  ;;  %v1088_v16 = vshrl.u32 %v262_v0, 7  ;;  %s408_s11 = scalar_lea.sflag [#allocation9], %s1040_s23 }
  0x5d   : > { %266 = vst.msk [vmem:[%s1058_s29] sm:$0x3] %vm1054_vm0, %v868_v2  ;;  %267 = vst.msk [vmem:[%s255_s6] sm:$0x3] %vm1054_vm0, %v868_v2  ;;  %v281_v8 = vsel %vm273_vm1, %v271_v5, -inf  ;;  %v1076_v12 = vsel %vm356_vm2, 1.0, %v868_v2 }
  0x5e   : > { %v276_v10 = vmax.f32 %v274_v6, %v275_v7  ;;  %v282_v11 = vrot.slane %v281_v8, 4  ;;  %s746_s19 = scalar_lea.vmem %s1086_s4, 32  ;;  %p1206_p0 = scmp.ne.s32.totalorder %s1196_s25, 0 }
  0x5f   : > { %p747_p8 = scmp.ne.s32.totalorder %s1086_s4, %s746_s19  ;;  %s869_s21 = smov [#allocation8]  }
  0x60   : > { %v277_v14 = vrot.slane %v276_v10, 2  ;;  %v283_v15 = vmax.f32 %v281_v8, %v282_v11  ;;  %s750_s8 = sshll.u32 %s869_s21, 4  ;;  %s751_s8 = int_to_ptr.vmem [resolvable:$false] %s750_s8 }
  0x61   : > { %p748_p7 = pnand %p747_p8, %p1206_p0  ;;  %s752_s10 = scalar_lea.vmem %s751_s8, 64 }
  0x62   : > { %v278_v17 = vmax.f32 %v276_v10, %v277_v14  ;;  %v284_v18 = vrot.slane %v283_v15, 2  ;;  %p753_p10 = scmp.lt.s32.totalorder %s1086_s4, %s751_s8  ;;  %p754_p12 = scmp.lt.s32.totalorder %s752_s10, %s746_s19 }
  0x63   : > { %p749_p4 = pneg %p748_p7 }
  0x64   : > { %v399_v9 = vld [vmem:[%s255_s6] sm:$0x3]  ;;  %p755_p1 = por %p754_p12, %p753_p10 }
  0x65   : > { %v400_v13 = vadd.f32 %v1076_v12, %v399_v9 }
  0x66   : > { %p756_p2 = pnand %p755_p1, %p749_p4 }
  0x67   : > { %401 = vst.msk [vmem:[%s255_s6] sm:$0x3] %vm1054_vm0, %v400_v13 }
  0x68   : > { %759 = shalt.err (!%p756_p2)
}
  0x69   : > { %s760_s30 = scalar_lea.hbm %s1084_s28, 32  ;;  %s764_s22 = scalar_lea.hbm %s1191_s3, 64 }
  0x6a   : > { %p761_p9 = scmp.ne.s32.totalorder %s1084_s28, %s760_s30  ;;  %p765_p6 = scmp.lt.u32.totalorder %s1084_s28, %s1191_s3 }
  0x6b   : > { %p766_p13 = scmp.lt.u32.totalorder %s764_s22, %s760_s30  ;;  %p768_p8 = scmp.lt.u32.totalorder %s760_s30, %s1084_s28 }
  0x6c   : > { %p762_p11 = pnand %p761_p9, %p1206_p0 }
  0x6d   : > { %p767_p5 = por %p766_p13, %p765_p6 }
  0x6e   : > { %p763_p3 = pneg %p762_p11 }
  0x6f   : > { %p769_p7 = por %p768_p8, %p767_p5 }
  0x71   : > { %p770_p4 = pnand %p769_p7, %p763_p3 }
  0x73   : > { %773 = shalt.err (!%p770_p4)
}
  0x74   : > { %610 = dma.vmem_to_hbm [thread:$0]  (%p1206_p0), %s1086_s4, 32, %s1084_s28, %s408_s11   ;;  %v279_v19 = vrot.slane %v278_v17, 1  ;;  %v285_v20 = vmax.f32 %v283_v15, %v284_v18  ;;  %v322_v21 = vsub.s32 0, %v1088_v16  ;;  %v326_v22 = vsub.s32 1, %v1088_v16 }
  0x75   : > { %s422_s4 = sshll.u32 %s1058_s29, 4  ;;  %s1136_s11 = scalar_lea.hbm %s1190_s2, %s603_s24  ;;  %s1138_s4 = int_to_ptr.vmem [resolvable:$true] %s422_s4 }
  0x76   : > { %v280_v23 = vmax.f32 %v278_v17, %v279_v19  ;;  %v286_v24 = vrot.slane %v285_v20, 1  ;;  %v323_v26 = vrot.slane %v269_v4, %v322_v21  ;;  %v327_v27 = vrot.slane %v269_v4, %v326_v22  ;;  %s403_s19 = scalar_lea.sflag [#allocation4], %s1040_s23  ;;  %s774_s21 = scalar_lea.vmem %s1138_s4, 32 }
  0x77   : > { %v870_v4 = vmov 1966171168   ;;  %v366_v10 = vrot.slane %v1076_v12, %v322_v21  ;;  %v370_v14 = vrot.slane %v1076_v12, %v326_v22  ;;  %p775_p10 = scmp.ne.s32.totalorder %s1138_s4, %s774_s21  ;;  %s871_s15 = smov [#allocation7]  }
  0x78   : > { %v287_v25 = vmax.f32 %v285_v20, %v286_v24  ;;  %vm328_vm3 = vcmp.eq.s32.totalorder %v1088_v16, %v323_v26  ;;  %vm329_vm4 = vcmp.eq.s32.totalorder %v1088_v16, %v327_v27  ;;  %v379_v5 = vunpack.c.l.s4 %v870_v4  ;;  %s778_s8 = sshll.u32 %s871_s15, 4  ;;  %s779_s8 = int_to_ptr.vmem [resolvable:$false] %s778_s8 }
  0x79   : > { %v590_v31 = vsel %vm328_vm3, 1.0, %v868_v2  ;;  %v591_v32 = vsel %vm329_vm4, 1.0, %v868_v2  ;;  %p776_p12 = pnand %p775_p10, %p1206_p0  ;;  %s780_s10 = scalar_lea.vmem %s779_s8, 64 }
  0x7a   : > { %v290_v28 = vcombine.low %v280_v23, %v287_v25  ;;  %v336_v33 = vcombine.low %v590_v31, %v591_v32  ;;  %v380_v15 = vunpack.c.0.s8 %v379_v5  ;;  %p781_p2 = scmp.lt.s32.totalorder %s1138_s4, %s779_s8  ;;  %p782_p9 = scmp.lt.s32.totalorder %s780_s10, %s774_s21 }
  0x7b   : > { %p777_p1 = pneg %p776_p12 }
  0x7c   : > { %v292_v29 = vsub.f32 %v1067_v3, %v290_v28  ;;  %v338_v34 = vmul.f32 %v336_v33, %v1067_v3  ;;  %v383_v20 = vsub.s32 %v380_v15, %v1088_v16  ;;  %p783_p11 = por %p782_p9, %p781_p2 }
  0x7e   : > { %v293_v30 = vmul.f32 1.442695, %v292_v29  ;;  %v340_v36 = vcombine.high %v338_v34, %v338_v34  ;;  %v342_v40 = vsel %vm273_vm1, %v338_v34, 0.0  ;;  %p784_p3 = pnand %p783_p11, %p777_p1 }
  0x7f   : > { %v343_v45 = vrot.slane %v342_v40, 4 }
  0x80   : > { %680 = vpow2.f32 %v293_v30  ;;  %v349_v44 = vsel %vm273_vm1, %v340_v36, 0.0 }
  0x81   : > { %v350_v48 = vrot.slane %v349_v44, 4  ;;  %v344_v51 = vadd.f32 %v343_v45, %v342_v40 }
  0x83   : > { %v351_v54 = vadd.f32 %v350_v48, %v349_v44  ;;  %v345_v57 = vrot.slane %v344_v51, 2 }
  0x85   : > { %v352_v59 = vrot.slane %v351_v54, 2  ;;  %v346_v60 = vadd.f32 %v345_v57, %v344_v51 }
  0x87   : > { %v353_v61 = vadd.f32 %v352_v59, %v351_v54  ;;  %v347_v62 = vrot.slane %v346_v60, 1 }
  0x89   : > { %v354_v63 = vrot.slane %v353_v61, 1  ;;  %v348_v3 = vadd.f32 %v347_v62, %v346_v60 }
  0x8a   : > { %v681_v35 = vpop.eup %680 }
  0x8b   : > { %v296_v37 = vcombine.high %v681_v35, %v681_v35  ;;  %v298_v38 = vsel %vm273_vm1, %v681_v35, 0.0  ;;  %v355_v9 = vadd.f32 %v354_v63, %v353_v61 }
  0x8c   : > { %v299_v39 = vrot.slane %v298_v38, 4 }
  0x8d   : > { %v305_v41 = vsel %vm273_vm1, %v296_v37, 0.0 }
  0x8e   : > { %v300_v42 = vadd.f32 %v299_v39, %v298_v38  ;;  %v306_v43 = vrot.slane %v305_v41, 4 }
  0x90   : > { %v301_v46 = vrot.slane %v300_v42, 2  ;;  %v307_v47 = vadd.f32 %v306_v43, %v305_v41 }
  0x92   : > { %v302_v49 = vadd.f32 %v301_v46, %v300_v42  ;;  %v308_v50 = vrot.slane %v307_v47, 2 }
  0x94   : > { %v303_v52 = vrot.slane %v302_v49, 1  ;;  %v309_v53 = vadd.f32 %v308_v50, %v307_v47 }
  0x96   : > { %v304_v55 = vadd.f32 %v303_v52, %v302_v49  ;;  %v310_v56 = vrot.slane %v309_v53, 1 }
  0x98   : > { %v311_v58 = vadd.f32 %v310_v56, %v309_v53  ;;  %682 = vlog2.f32 %v304_v55 }
  0x9a   : > { %684 = vlog2.f32 %v311_v58 }
  0xa2   : > { %v683_v0 = vpop.eup %682 }
  0xa3   : > { %v313_v2 = vmul.f32 0.6931472, %v683_v0 }
  0xa4   : > { %v685_v6 = vpop.eup %684 }
  0xa5   : > { %v315_v7 = vmul.f32 0.6931472, %v685_v6  ;;  %v316_v8 = vadd.f32 %v313_v2, %v280_v23  ;;  %v359_v23 = vld [vmem:[%s1058_s29] sm:$0x3] }
  0xa7   : > { %v317_v11 = vadd.f32 %v315_v7, %v287_v25  ;;  %v360_v13 = vsub.f32 %v316_v8, %v348_v3 }
  0xa9   : > { %v361_v17 = vsub.f32 %v317_v11, %v355_v9  ;;  %v373_v18 = vmul.f32 %v366_v10, %v360_v13 }
  0xab   : > { %v374_v19 = vmul.f32 %v370_v14, %v361_v17 }
  0xad   : > { %v377_v24 = vcombine.low %v373_v18, %v374_v19 }
  0xaf   : > { %v384_v26 = vrot.slane %v377_v24, %v383_v20 }
  0xb1   : > { %v391_v27 = vrot.slane %v384_v26, %v383_v20 }
  0xb3   : > { %v393_v28 = vadd.f32 %v391_v27, %v359_v23 }
  0xb5   : > { %398 = vst.msk [vmem:[%s1058_s29] sm:$0x3] %vm1054_vm0, %v393_v28 }
  0xb6   : > { %787 = shalt.err (!%p784_p3)
}
  0xb7   : > { %s788_s23 = scalar_lea.hbm %s1136_s11, 32  ;;  %s792_s30 = scalar_lea.hbm %s1190_s2, 64 }
  0xb8   : > { %p789_p6 = scmp.ne.s32.totalorder %s1136_s11, %s788_s23  ;;  %p793_p8 = scmp.lt.u32.totalorder %s1136_s11, %s1190_s2 }
  0xb9   : > { %p794_p7 = scmp.lt.u32.totalorder %s792_s30, %s788_s23  ;;  %p796_p10 = scmp.lt.u32.totalorder %s788_s23, %s1136_s11 }
  0xba   : > { %p790_p13 = pnand %p789_p6, %p1206_p0 }
  0xbb   : > { %p795_p4 = por %p794_p7, %p793_p8 }
  0xbc   : > { %p791_p5 = pneg %p790_p13 }
  0xbd   : > { %p797_p12 = por %p796_p10, %p795_p4 }
  0xbf   : > { %p798_p1 = pnand %p797_p12, %p791_p5 }
  0xc1   : > { %801 = shalt.err (!%p798_p1)
}
  0xc2   : > { %609 = dma.vmem_to_hbm [thread:$0]  (%p1206_p0), %s1138_s4, 32, %s1136_s11, %s403_s19  }
  0xc3 PF: > { %s448_s22 = sand.u32 1, %s844_s12   ;;  %p1207_p2 = scmp.ne.s32.totalorder %s1197_s27, 0 }
  0xc4   : > { %p1208_p9 = scmp.ge.s32.totalorder %s864_s17, 2  ;;  %s449_s6 = scalar_lea.sflag [#allocation4], %s448_s22 }
  0xc6   : > { %p621_p11 = pnand %p1208_p9, %p1207_p2 }
  0xc8   : > { %835 = dma.done.wait (!%p621_p11), %s449_s6, 32  }
  0xc9   : > { %837 = vsyncadd (!%p621_p11), %s449_s6, 4294967264  ;;  %s458_s5 = scalar_lea.sflag [#allocation9], %s448_s22 }
  0xca   : > { %839 = dma.done.wait (!%p621_p11), %s458_s5, 32  }
  0xcb   : > { %841 = vsyncadd (!%p621_p11), %s458_s5, 4294967264  ;;  %s26_s17 = sadd.s32 1, %s864_s17   ;;  %s1209_s12 = smov %s848_s13 }
  0xcc   : > { %p23_p3 = scmp.ge.s32.totalorder %s26_s17, 4   ;;  %s1210_s13 = smov %s852_s14 }
  0xcd   : > { %s1211_s14 = smov %s948_s26  ;;  %s1212_s15 = smov %s860_s16 }
  0xce   : > { %s1213_s16 = smov %s1215_s20  ;;  %25 = sbr.rel (!%p23_p3) target bundleno = 10 (0xa), region = 107 }
  0xd5   :  { %463 = vsyncpa [#allocation3], 1 }
  0xd6   :  { %465 = vsyncpa [#allocation3 + $0x1], 1 }
  0xd7   :  { %466 = vsyncpa [#allocation6], 1 }
  0xd8   :  { %468 = vsyncpa [#allocation6 + $0x1], 1 }
  0xd9   :  { %469 = vsyncpa [#allocation4], 1 }
  0xda   :  { %471 = vsyncpa [#allocation4 + $0x1], 1 }
  0xdb   :  { %472 = vsyncpa [#allocation9], 1 }
  0xdc   :  { %474 = vsyncpa [#allocation9 + $0x1], 1 }

</bundles_post_ra>
